<compile_context>
chip_gen: v5e
topology: v5e:2x2
jax: 0.10.0
libtpu: 0.0.40
codegen_flags: <defaults>
</compile_context>

<pallas_src>
import functools

import jax
import jax.numpy as jnp
from jax.experimental import pallas as pl
from jax.experimental.pallas import tpu as pltpu

NEG_SLOPE = 0.2  # nn.LeakyReLU(negative_slope=0.2)


def _leaky_relu(v):
    return jnp.where(v >= 0.0, v, NEG_SLOPE * v)


# ---------------------------------------------------------------------------
# Fused Pallas kernel: conv1x1 -> lrelu -> conv3x3 -> lrelu -> conv1x1 (+skip)
# ---------------------------------------------------------------------------
def _residual_block_kernel(x_ref, m_ref, w1_ref, b1_ref, w2_ref, b2_ref,
                           w3_ref, b3_ref, *rest, has_skip, width):
    """Fused Residual block for one batch element (channels-major, HW on lanes).

    x_ref : (1, Cin, HW)      input image, spatially flattened
    m_ref : (9, 1, HW)        per-tap boundary masks for the 3x3 "same" conv
    w1_ref: (hdim, Cin)       1x1 conv weight        b1_ref: (hdim, 1)
    w2_ref: (9, hdim, hdim)   3x3 conv weight, tap-major (dy*3+dx)
                                                     b2_ref: (hdim, 1)
    w3_ref: (outs, hdim)      1x1 conv weight        b3_ref: (outs, 1)
    [wsk_ref: (outs, Cin), bsk_ref: (outs, 1)]       skip 1x1 conv (ins != outs)
    o_ref : (1, outs, HW)
    """
    if has_skip:
        wsk_ref, bsk_ref, o_ref = rest
    else:
        (o_ref,) = rest

    x = x_ref[0]                                              # (Cin, HW)

    # conv1x1 + LeakyReLU     (MXU: (hdim, Cin) @ (Cin, HW))
    h1 = jnp.dot(w1_ref[...], x, preferred_element_type=jnp.float32)
    h1 = _leaky_relu(h1 + b1_ref[...])

    # conv3x3 "same": 9 tap matmuls on lane-rolled, boundary-masked copies of h1.
    hw = h1.shape[-1]
    acc = jnp.zeros((w2_ref.shape[1], hw), jnp.float32)
    for t in range(9):                                        # static unrolled loop
        oy, ox = t // 3 - 1, t % 3 - 1
        if oy == 0 and ox == 0:
            shifted = h1                                      # center tap: no shift/mask
        else:
            shift = (-(oy * width + ox)) % hw                 # static lane rotation
            shifted = pltpu.roll(h1, shift=shift, axis=1) * m_ref[t]
        acc = acc + jnp.dot(w2_ref[t], shifted, preferred_element_type=jnp.float32)
    h2 = _leaky_relu(acc + b2_ref[...])

    # conv1x1 (no activation)
    out = jnp.dot(w3_ref[...], h2, preferred_element_type=jnp.float32) + b3_ref[...]

    # residual add, fused into the epilogue
    if has_skip:
        res = jnp.dot(wsk_ref[...], x, preferred_element_type=jnp.float32) + bsk_ref[...]
    else:
        res = x.astype(jnp.float32)

    o_ref[0] = (out + res).astype(o_ref.dtype)


# ---------------------------------------------------------------------------
# Wrapper
# ---------------------------------------------------------------------------
def residual_forward(x_nchw, params):
    """Pallas forward of the PyTorch `Residual` module.  x_nchw: (N, ins, H, W)."""
    n, cin, h, w = x_nchw.shape
    w1, b1 = params["conv1"]
    w2, b2 = params["conv2"]
    w3, b3 = params["conv3"]
    hdim = w1.shape[0]
    outs = w3.shape[0]
    has_skip = "skip" in params
    hw = h * w

    x_flat = x_nchw.reshape(n, cin, hw)                      # free reshape (NCHW contiguous)

    # Weight prep: 1x1 convs -> plain matrices; 3x3 -> tap-major (9, out, in).
    w1m = w1.reshape(hdim, cin)
    w2m = jnp.transpose(w2, (2, 3, 0, 1)).reshape(9, hdim, hdim)
    w3m = w3.reshape(outs, hdim)
    b1m, b2m, b3m = b1.reshape(hdim, 1), b2.reshape(hdim, 1), b3.reshape(outs, 1)

    # Static per-tap boundary masks over the flattened spatial axis (zero padding).
    rows = jnp.arange(hw, dtype=jnp.int32) // w
    cols = jnp.arange(hw, dtype=jnp.int32) % w
    masks = []
    for t in range(9):
        oy, ox = t // 3 - 1, t % 3 - 1
        valid = ((rows + oy >= 0) & (rows + oy < h) &
                 (cols + ox >= 0) & (cols + ox < w))
        masks.append(valid.astype(x_nchw.dtype))
    masks = jnp.stack(masks).reshape(9, 1, hw)

    inputs = [x_flat, masks, w1m, b1m, w2m, b2m, w3m, b3m]
    in_specs = [
        pl.BlockSpec((1, cin, hw), lambda i: (i, 0, 0)),      # per-batch image tile
        pl.BlockSpec((9, 1, hw), lambda i: (0, 0, 0)),        # grid-invariant masks
        pl.BlockSpec((hdim, cin), lambda i: (0, 0)),
        pl.BlockSpec((hdim, 1), lambda i: (0, 0)),
        pl.BlockSpec((9, hdim, hdim), lambda i: (0, 0, 0)),
        pl.BlockSpec((hdim, 1), lambda i: (0, 0)),
        pl.BlockSpec((outs, hdim), lambda i: (0, 0)),
        pl.BlockSpec((outs, 1), lambda i: (0, 0)),
    ]
    if has_skip:
        wsk, bsk = params["skip"]
        inputs += [wsk.reshape(outs, cin), bsk.reshape(outs, 1)]
        in_specs += [pl.BlockSpec((outs, cin), lambda i: (0, 0)),
                     pl.BlockSpec((outs, 1), lambda i: (0, 0))]

    flops = 2 * n * hw * (cin * hdim + 9 * hdim * hdim + hdim * outs
                          + (cin * outs if has_skip else 0))
    param_bytes = sum(int(a.size) * a.dtype.itemsize for a in inputs[1:])
    bytes_accessed = 4 * n * (cin + outs) * hw + param_bytes

    kernel = functools.partial(_residual_block_kernel, has_skip=has_skip, width=w)
    out = pl.pallas_call(
        kernel,
        out_shape=jax.ShapeDtypeStruct((n, outs, hw), x_nchw.dtype),
        grid=(n,),
        in_specs=in_specs,
        out_specs=pl.BlockSpec((1, outs, hw), lambda i: (i, 0, 0)),
        compiler_params=pltpu.CompilerParams(dimension_semantics=("parallel",)),
        cost_estimate=pl.CostEstimate(flops=int(flops), transcendentals=0,
                                      bytes_accessed=int(bytes_accessed)),
    )(*inputs)
    return out.reshape(n, outs, h, w)


# ---------------------------------------------------------------------------
# Pure-XLA reference (for a correctness check)
# ---------------------------------------------------------------------------
def _conv2d_ref(x, wgt, bias, padding):
    out = jax.lax.conv_general_dilated(
        x, wgt, window_strides=(1, 1), padding=padding,
        dimension_numbers=("NCHW", "OIHW", "NCHW"))
    return out + bias.reshape(1, -1, 1, 1)


def residual_forward_ref(x, params):
    w1, b1 = params["conv1"]
    w2, b2 = params["conv2"]
    w3, b3 = params["conv3"]
    hid = _leaky_relu(_conv2d_ref(x, w1, b1, "VALID"))
    hid = _leaky_relu(_conv2d_ref(hid, w2, b2, ((1, 1), (1, 1))))
    out = _conv2d_ref(hid, w3, b3, "VALID")
    res = _conv2d_ref(x, *params["skip"], padding="VALID") if "skip" in params else x
    return out + res


# ---------------------------------------------------------------------------
# Deterministic parameter construction (shapes follow the PyTorch __init__)
# ---------------------------------------------------------------------------
def init_residual_params(key, ins, outs):
    hdim = outs // 2

    def conv_init(k, cout, cin, ksz):
        kw, kb = jax.random.split(k)
        bound = 1.0 / float(cin * ksz * ksz) ** 0.5
        wgt = jax.random.uniform(kw, (cout, cin, ksz, ksz), jnp.float32, -bound, bound)
        bia = jax.random.uniform(kb, (cout,), jnp.float32, -bound, bound)
        return wgt, bia

    k1, k2, k3, k4 = jax.random.split(key, 4)
    params = {
        "conv1": conv_init(k1, hdim, ins, 1),
        "conv2": conv_init(k2, hdim, hdim, 3),
        "conv3": conv_init(k3, outs, hdim, 1),
    }
    if ins != outs:
        params["skip"] = conv_init(k4, outs, ins, 1)
    return params


# ---------------------------------------------------------------------------
if __name__ == "__main__":
    INS, OUTS = 4, 8            # ins != outs -> skipConv path exercised; hdim = 4
    N, H, W = 2, 16, 16         # H*W = 256 -> lane-dense (multiple of 128)

    key = jax.random.PRNGKey(0)
    pkey, xkey = jax.random.split(key)
    params = init_residual_params(pkey, INS, OUTS)
    x = jax.random.normal(xkey, (N, INS, H, W), jnp.float32)

    fwd = jax.jit(residual_forward)
    out = fwd(x, params)
    jax.block_until_ready(out)

    assert out.shape == (N, OUTS, H, W), out.shape
    assert out.dtype == x.dtype
    assert bool(jnp.all(jnp.isfinite(out)))

    # Numerical check vs plain-XLA reference (loose tolerance: both paths use the
    # TPU's default f32-via-bf16 matmul precision).
    ref = residual_forward_ref(x, params)
    max_err = float(jnp.max(jnp.abs(out - ref)))
    assert max_err < 2e-2, f"max abs error vs reference: {max_err}"

    print("KERNEL_OK")
</pallas_src>

<mosaic_0001>
module attributes {stable_mosaic.version = 11 : i64} {
  func.func @_residual_block_kernel(%arg0: i32, %arg1: memref<1x4x256xf32, #tpu.memory_space<vmem>>, %arg2: memref<9x1x256xf32, #tpu.memory_space<vmem>>, %arg3: memref<4x4xf32, #tpu.memory_space<vmem>>, %arg4: memref<4x1xf32, #tpu.memory_space<vmem>>, %arg5: memref<9x4x4xf32, #tpu.memory_space<vmem>>, %arg6: memref<4x1xf32, #tpu.memory_space<vmem>>, %arg7: memref<8x4xf32, #tpu.memory_space<vmem>>, %arg8: memref<8x1xf32, #tpu.memory_space<vmem>>, %arg9: memref<8x4xf32, #tpu.memory_space<vmem>>, %arg10: memref<8x1xf32, #tpu.memory_space<vmem>>, %arg11: memref<1x8x256xf32, #tpu.memory_space<vmem>>) attributes {dimension_semantics = [#tpu.dimension_semantics<parallel>], iteration_bounds = array<i64: 2>, scalar_prefetch = 0 : i64, scratch_operands = 0 : i64, tpu.core_type = #tpu.core_type<tc>, window_params = [{transform_indices = @transform_0, window_bounds = array<i64: 1, 4, 256>}, {pipeline_mode = #tpu.pipeline_mode<synchronous>, transform_indices = @transform_1, window_bounds = array<i64: 9, 1, 256>}, {pipeline_mode = #tpu.pipeline_mode<synchronous>, transform_indices = @transform_2, window_bounds = array<i64: 4, 4>}, {pipeline_mode = #tpu.pipeline_mode<synchronous>, transform_indices = @transform_3, window_bounds = array<i64: 4, 1>}, {pipeline_mode = #tpu.pipeline_mode<synchronous>, transform_indices = @transform_4, window_bounds = array<i64: 9, 4, 4>}, {pipeline_mode = #tpu.pipeline_mode<synchronous>, transform_indices = @transform_5, window_bounds = array<i64: 4, 1>}, {pipeline_mode = #tpu.pipeline_mode<synchronous>, transform_indices = @transform_6, window_bounds = array<i64: 8, 4>}, {pipeline_mode = #tpu.pipeline_mode<synchronous>, transform_indices = @transform_7, window_bounds = array<i64: 8, 1>}, {pipeline_mode = #tpu.pipeline_mode<synchronous>, transform_indices = @transform_8, window_bounds = array<i64: 8, 4>}, {pipeline_mode = #tpu.pipeline_mode<synchronous>, transform_indices = @transform_9, window_bounds = array<i64: 8, 1>}, {transform_indices = @transform_10, window_bounds = array<i64: 1, 8, 256>}]} {
    %c0 = arith.constant 0 : index
    %c0_0 = arith.constant 0 : index
    %c0_1 = arith.constant 0 : index
    %0 = vector.load %arg1[%c0, %c0_0, %c0_1] : memref<1x4x256xf32, #tpu.memory_space<vmem>>, vector<1x4x256xf32>
    %1 = vector.shape_cast %0 : vector<1x4x256xf32> to vector<4x256xf32>
    %c0_2 = arith.constant 0 : index
    %c0_3 = arith.constant 0 : index
    %2 = vector.load %arg3[%c0_2, %c0_3] : memref<4x4xf32, #tpu.memory_space<vmem>>, vector<4x4xf32>
    %cst = arith.constant dense<0.000000e+00> : vector<4x256xf32>
    %3 = tpu.matmul %2, %1, %cst {dimension_numbers = #tpu.dot_dimension_numbers<[1], [0], [0], [1], [0, 0, 1, 1], [], []>} : vector<4x4xf32>, vector<4x256xf32>, vector<4x256xf32> -> vector<4x256xf32>
    %c0_4 = arith.constant 0 : index
    %c0_5 = arith.constant 0 : index
    %4 = vector.load %arg4[%c0_4, %c0_5] : memref<4x1xf32, #tpu.memory_space<vmem>>, vector<4x1xf32>
    %5 = vector.broadcast %4 : vector<4x1xf32> to vector<4x256xf32>
    %6 = arith.addf %3, %5 : vector<4x256xf32>
    %cst_6 = arith.constant 0.000000e+00 : f32
    %7 = vector.broadcast %cst_6 : f32 to vector<4x256xf32>
    %8 = arith.cmpf oge, %6, %7 : vector<4x256xf32>
    %cst_7 = arith.constant 2.000000e-01 : f32
    %9 = vector.broadcast %cst_7 : f32 to vector<4x256xf32>
    %10 = arith.mulf %9, %6 : vector<4x256xf32>
    %11 = arith.select %8, %6, %10 : vector<4x256xi1>, vector<4x256xf32>
    %cst_8 = arith.constant 0.000000e+00 : f32
    %12 = vector.broadcast %cst_8 : f32 to vector<4x256xf32>
    %c17_i32 = arith.constant 17 : i32
    %13 = tpu.dynamic_rotate %11 by %c17_i32 dim 1 : vector<4x256xf32>, i32 -> vector<4x256xf32>
    %c0_9 = arith.constant 0 : index
    %c0_10 = arith.constant 0 : index
    %c0_11 = arith.constant 0 : index
    %14 = vector.load %arg2[%c0_9, %c0_10, %c0_11] : memref<9x1x256xf32, #tpu.memory_space<vmem>>, vector<1x1x256xf32>
    %15 = vector.shape_cast %14 : vector<1x1x256xf32> to vector<1x256xf32>
    %16 = vector.broadcast %15 : vector<1x256xf32> to vector<4x256xf32>
    %17 = arith.mulf %13, %16 : vector<4x256xf32>
    %c0_12 = arith.constant 0 : index
    %c0_13 = arith.constant 0 : index
    %c0_14 = arith.constant 0 : index
    %18 = vector.load %arg5[%c0_12, %c0_13, %c0_14] : memref<9x4x4xf32, #tpu.memory_space<vmem>>, vector<1x4x4xf32>
    %19 = vector.shape_cast %18 : vector<1x4x4xf32> to vector<4x4xf32>
    %cst_15 = arith.constant dense<0.000000e+00> : vector<4x256xf32>
    %20 = tpu.matmul %19, %17, %cst_15 {dimension_numbers = #tpu.dot_dimension_numbers<[1], [0], [0], [1], [0, 0, 1, 1], [], []>} : vector<4x4xf32>, vector<4x256xf32>, vector<4x256xf32> -> vector<4x256xf32>
    %21 = arith.addf %12, %20 : vector<4x256xf32>
    %c16_i32 = arith.constant 16 : i32
    %22 = tpu.dynamic_rotate %11 by %c16_i32 dim 1 : vector<4x256xf32>, i32 -> vector<4x256xf32>
    %c1 = arith.constant 1 : index
    %c0_16 = arith.constant 0 : index
    %c0_17 = arith.constant 0 : index
    %23 = vector.load %arg2[%c1, %c0_16, %c0_17] : memref<9x1x256xf32, #tpu.memory_space<vmem>>, vector<1x1x256xf32>
    %24 = vector.shape_cast %23 : vector<1x1x256xf32> to vector<1x256xf32>
    %25 = vector.broadcast %24 : vector<1x256xf32> to vector<4x256xf32>
    %26 = arith.mulf %22, %25 : vector<4x256xf32>
    %c1_18 = arith.constant 1 : index
    %c0_19 = arith.constant 0 : index
    %c0_20 = arith.constant 0 : index
    %27 = vector.load %arg5[%c1_18, %c0_19, %c0_20] : memref<9x4x4xf32, #tpu.memory_space<vmem>>, vector<1x4x4xf32>
    %28 = vector.shape_cast %27 : vector<1x4x4xf32> to vector<4x4xf32>
    %cst_21 = arith.constant dense<0.000000e+00> : vector<4x256xf32>
    %29 = tpu.matmul %28, %26, %cst_21 {dimension_numbers = #tpu.dot_dimension_numbers<[1], [0], [0], [1], [0, 0, 1, 1], [], []>} : vector<4x4xf32>, vector<4x256xf32>, vector<4x256xf32> -> vector<4x256xf32>
    %30 = arith.addf %21, %29 : vector<4x256xf32>
    %c15_i32 = arith.constant 15 : i32
    %31 = tpu.dynamic_rotate %11 by %c15_i32 dim 1 : vector<4x256xf32>, i32 -> vector<4x256xf32>
    %c2 = arith.constant 2 : index
    %c0_22 = arith.constant 0 : index
    %c0_23 = arith.constant 0 : index
    %32 = vector.load %arg2[%c2, %c0_22, %c0_23] : memref<9x1x256xf32, #tpu.memory_space<vmem>>, vector<1x1x256xf32>
    %33 = vector.shape_cast %32 : vector<1x1x256xf32> to vector<1x256xf32>
    %34 = vector.broadcast %33 : vector<1x256xf32> to vector<4x256xf32>
    %35 = arith.mulf %31, %34 : vector<4x256xf32>
    %c2_24 = arith.constant 2 : index
    %c0_25 = arith.constant 0 : index
    %c0_26 = arith.constant 0 : index
    %36 = vector.load %arg5[%c2_24, %c0_25, %c0_26] : memref<9x4x4xf32, #tpu.memory_space<vmem>>, vector<1x4x4xf32>
    %37 = vector.shape_cast %36 : vector<1x4x4xf32> to vector<4x4xf32>
    %cst_27 = arith.constant dense<0.000000e+00> : vector<4x256xf32>
    %38 = tpu.matmul %37, %35, %cst_27 {dimension_numbers = #tpu.dot_dimension_numbers<[1], [0], [0], [1], [0, 0, 1, 1], [], []>} : vector<4x4xf32>, vector<4x256xf32>, vector<4x256xf32> -> vector<4x256xf32>
    %39 = arith.addf %30, %38 : vector<4x256xf32>
    %c1_i32 = arith.constant 1 : i32
    %40 = tpu.dynamic_rotate %11 by %c1_i32 dim 1 : vector<4x256xf32>, i32 -> vector<4x256xf32>
    %c3 = arith.constant 3 : index
    %c0_28 = arith.constant 0 : index
    %c0_29 = arith.constant 0 : index
    %41 = vector.load %arg2[%c3, %c0_28, %c0_29] : memref<9x1x256xf32, #tpu.memory_space<vmem>>, vector<1x1x256xf32>
    %42 = vector.shape_cast %41 : vector<1x1x256xf32> to vector<1x256xf32>
    %43 = vector.broadcast %42 : vector<1x256xf32> to vector<4x256xf32>
    %44 = arith.mulf %40, %43 : vector<4x256xf32>
    %c3_30 = arith.constant 3 : index
    %c0_31 = arith.constant 0 : index
    %c0_32 = arith.constant 0 : index
    %45 = vector.load %arg5[%c3_30, %c0_31, %c0_32] : memref<9x4x4xf32, #tpu.memory_space<vmem>>, vector<1x4x4xf32>
    %46 = vector.shape_cast %45 : vector<1x4x4xf32> to vector<4x4xf32>
    %cst_33 = arith.constant dense<0.000000e+00> : vector<4x256xf32>
    %47 = tpu.matmul %46, %44, %cst_33 {dimension_numbers = #tpu.dot_dimension_numbers<[1], [0], [0], [1], [0, 0, 1, 1], [], []>} : vector<4x4xf32>, vector<4x256xf32>, vector<4x256xf32> -> vector<4x256xf32>
    %48 = arith.addf %39, %47 : vector<4x256xf32>
    %c4 = arith.constant 4 : index
    %c0_34 = arith.constant 0 : index
    %c0_35 = arith.constant 0 : index
    %49 = vector.load %arg5[%c4, %c0_34, %c0_35] : memref<9x4x4xf32, #tpu.memory_space<vmem>>, vector<1x4x4xf32>
    %50 = vector.shape_cast %49 : vector<1x4x4xf32> to vector<4x4xf32>
    %cst_36 = arith.constant dense<0.000000e+00> : vector<4x256xf32>
    %51 = tpu.matmul %50, %11, %cst_36 {dimension_numbers = #tpu.dot_dimension_numbers<[1], [0], [0], [1], [0, 0, 1, 1], [], []>} : vector<4x4xf32>, vector<4x256xf32>, vector<4x256xf32> -> vector<4x256xf32>
    %52 = arith.addf %48, %51 : vector<4x256xf32>
    %c255_i32 = arith.constant 255 : i32
    %53 = tpu.dynamic_rotate %11 by %c255_i32 dim 1 : vector<4x256xf32>, i32 -> vector<4x256xf32>
    %c5 = arith.constant 5 : index
    %c0_37 = arith.constant 0 : index
    %c0_38 = arith.constant 0 : index
    %54 = vector.load %arg2[%c5, %c0_37, %c0_38] : memref<9x1x256xf32, #tpu.memory_space<vmem>>, vector<1x1x256xf32>
    %55 = vector.shape_cast %54 : vector<1x1x256xf32> to vector<1x256xf32>
    %56 = vector.broadcast %55 : vector<1x256xf32> to vector<4x256xf32>
    %57 = arith.mulf %53, %56 : vector<4x256xf32>
    %c5_39 = arith.constant 5 : index
    %c0_40 = arith.constant 0 : index
    %c0_41 = arith.constant 0 : index
    %58 = vector.load %arg5[%c5_39, %c0_40, %c0_41] : memref<9x4x4xf32, #tpu.memory_space<vmem>>, vector<1x4x4xf32>
    %59 = vector.shape_cast %58 : vector<1x4x4xf32> to vector<4x4xf32>
    %cst_42 = arith.constant dense<0.000000e+00> : vector<4x256xf32>
    %60 = tpu.matmul %59, %57, %cst_42 {dimension_numbers = #tpu.dot_dimension_numbers<[1], [0], [0], [1], [0, 0, 1, 1], [], []>} : vector<4x4xf32>, vector<4x256xf32>, vector<4x256xf32> -> vector<4x256xf32>
    %61 = arith.addf %52, %60 : vector<4x256xf32>
    %c241_i32 = arith.constant 241 : i32
    %62 = tpu.dynamic_rotate %11 by %c241_i32 dim 1 : vector<4x256xf32>, i32 -> vector<4x256xf32>
    %c6 = arith.constant 6 : index
    %c0_43 = arith.constant 0 : index
    %c0_44 = arith.constant 0 : index
    %63 = vector.load %arg2[%c6, %c0_43, %c0_44] : memref<9x1x256xf32, #tpu.memory_space<vmem>>, vector<1x1x256xf32>
    %64 = vector.shape_cast %63 : vector<1x1x256xf32> to vector<1x256xf32>
    %65 = vector.broadcast %64 : vector<1x256xf32> to vector<4x256xf32>
    %66 = arith.mulf %62, %65 : vector<4x256xf32>
    %c6_45 = arith.constant 6 : index
    %c0_46 = arith.constant 0 : index
    %c0_47 = arith.constant 0 : index
    %67 = vector.load %arg5[%c6_45, %c0_46, %c0_47] : memref<9x4x4xf32, #tpu.memory_space<vmem>>, vector<1x4x4xf32>
    %68 = vector.shape_cast %67 : vector<1x4x4xf32> to vector<4x4xf32>
    %cst_48 = arith.constant dense<0.000000e+00> : vector<4x256xf32>
    %69 = tpu.matmul %68, %66, %cst_48 {dimension_numbers = #tpu.dot_dimension_numbers<[1], [0], [0], [1], [0, 0, 1, 1], [], []>} : vector<4x4xf32>, vector<4x256xf32>, vector<4x256xf32> -> vector<4x256xf32>
    %70 = arith.addf %61, %69 : vector<4x256xf32>
    %c240_i32 = arith.constant 240 : i32
    %71 = tpu.dynamic_rotate %11 by %c240_i32 dim 1 : vector<4x256xf32>, i32 -> vector<4x256xf32>
    %c7 = arith.constant 7 : index
    %c0_49 = arith.constant 0 : index
    %c0_50 = arith.constant 0 : index
    %72 = vector.load %arg2[%c7, %c0_49, %c0_50] : memref<9x1x256xf32, #tpu.memory_space<vmem>>, vector<1x1x256xf32>
    %73 = vector.shape_cast %72 : vector<1x1x256xf32> to vector<1x256xf32>
    %74 = vector.broadcast %73 : vector<1x256xf32> to vector<4x256xf32>
    %75 = arith.mulf %71, %74 : vector<4x256xf32>
    %c7_51 = arith.constant 7 : index
    %c0_52 = arith.constant 0 : index
    %c0_53 = arith.constant 0 : index
    %76 = vector.load %arg5[%c7_51, %c0_52, %c0_53] : memref<9x4x4xf32, #tpu.memory_space<vmem>>, vector<1x4x4xf32>
    %77 = vector.shape_cast %76 : vector<1x4x4xf32> to vector<4x4xf32>
    %cst_54 = arith.constant dense<0.000000e+00> : vector<4x256xf32>
    %78 = tpu.matmul %77, %75, %cst_54 {dimension_numbers = #tpu.dot_dimension_numbers<[1], [0], [0], [1], [0, 0, 1, 1], [], []>} : vector<4x4xf32>, vector<4x256xf32>, vector<4x256xf32> -> vector<4x256xf32>
    %79 = arith.addf %70, %78 : vector<4x256xf32>
    %c239_i32 = arith.constant 239 : i32
    %80 = tpu.dynamic_rotate %11 by %c239_i32 dim 1 : vector<4x256xf32>, i32 -> vector<4x256xf32>
    %c8 = arith.constant 8 : index
    %c0_55 = arith.constant 0 : index
    %c0_56 = arith.constant 0 : index
    %81 = vector.load %arg2[%c8, %c0_55, %c0_56] : memref<9x1x256xf32, #tpu.memory_space<vmem>>, vector<1x1x256xf32>
    %82 = vector.shape_cast %81 : vector<1x1x256xf32> to vector<1x256xf32>
    %83 = vector.broadcast %82 : vector<1x256xf32> to vector<4x256xf32>
    %84 = arith.mulf %80, %83 : vector<4x256xf32>
    %c8_57 = arith.constant 8 : index
    %c0_58 = arith.constant 0 : index
    %c0_59 = arith.constant 0 : index
    %85 = vector.load %arg5[%c8_57, %c0_58, %c0_59] : memref<9x4x4xf32, #tpu.memory_space<vmem>>, vector<1x4x4xf32>
    %86 = vector.shape_cast %85 : vector<1x4x4xf32> to vector<4x4xf32>
    %cst_60 = arith.constant dense<0.000000e+00> : vector<4x256xf32>
    %87 = tpu.matmul %86, %84, %cst_60 {dimension_numbers = #tpu.dot_dimension_numbers<[1], [0], [0], [1], [0, 0, 1, 1], [], []>} : vector<4x4xf32>, vector<4x256xf32>, vector<4x256xf32> -> vector<4x256xf32>
    %88 = arith.addf %79, %87 : vector<4x256xf32>
    %c0_61 = arith.constant 0 : index
    %c0_62 = arith.constant 0 : index
    %89 = vector.load %arg6[%c0_61, %c0_62] : memref<4x1xf32, #tpu.memory_space<vmem>>, vector<4x1xf32>
    %90 = vector.broadcast %89 : vector<4x1xf32> to vector<4x256xf32>
    %91 = arith.addf %88, %90 : vector<4x256xf32>
    %cst_63 = arith.constant 0.000000e+00 : f32
    %92 = vector.broadcast %cst_63 : f32 to vector<4x256xf32>
    %93 = arith.cmpf oge, %91, %92 : vector<4x256xf32>
    %cst_64 = arith.constant 2.000000e-01 : f32
    %94 = vector.broadcast %cst_64 : f32 to vector<4x256xf32>
    %95 = arith.mulf %94, %91 : vector<4x256xf32>
    %96 = arith.select %93, %91, %95 : vector<4x256xi1>, vector<4x256xf32>
    %c0_65 = arith.constant 0 : index
    %c0_66 = arith.constant 0 : index
    %97 = vector.load %arg7[%c0_65, %c0_66] : memref<8x4xf32, #tpu.memory_space<vmem>>, vector<8x4xf32>
    %cst_67 = arith.constant dense<0.000000e+00> : vector<8x256xf32>
    %98 = tpu.matmul %97, %96, %cst_67 {dimension_numbers = #tpu.dot_dimension_numbers<[1], [0], [0], [1], [0, 0, 1, 1], [], []>} : vector<8x4xf32>, vector<4x256xf32>, vector<8x256xf32> -> vector<8x256xf32>
    %c0_68 = arith.constant 0 : index
    %c0_69 = arith.constant 0 : index
    %99 = vector.load %arg8[%c0_68, %c0_69] : memref<8x1xf32, #tpu.memory_space<vmem>>, vector<8x1xf32>
    %100 = vector.broadcast %99 : vector<8x1xf32> to vector<8x256xf32>
    %101 = arith.addf %98, %100 : vector<8x256xf32>
    %c0_70 = arith.constant 0 : index
    %c0_71 = arith.constant 0 : index
    %102 = vector.load %arg9[%c0_70, %c0_71] : memref<8x4xf32, #tpu.memory_space<vmem>>, vector<8x4xf32>
    %cst_72 = arith.constant dense<0.000000e+00> : vector<8x256xf32>
    %103 = tpu.matmul %102, %1, %cst_72 {dimension_numbers = #tpu.dot_dimension_numbers<[1], [0], [0], [1], [0, 0, 1, 1], [], []>} : vector<8x4xf32>, vector<4x256xf32>, vector<8x256xf32> -> vector<8x256xf32>
    %c0_73 = arith.constant 0 : index
    %c0_74 = arith.constant 0 : index
    %104 = vector.load %arg10[%c0_73, %c0_74] : memref<8x1xf32, #tpu.memory_space<vmem>>, vector<8x1xf32>
    %105 = vector.broadcast %104 : vector<8x1xf32> to vector<8x256xf32>
    %106 = arith.addf %103, %105 : vector<8x256xf32>
    %107 = arith.addf %101, %106 : vector<8x256xf32>
    %c0_75 = arith.constant 0 : index
    %c0_76 = arith.constant 0 : index
    %c0_77 = arith.constant 0 : index
    %108 = vector.load %arg11[%c0_75, %c0_76, %c0_77] : memref<1x8x256xf32, #tpu.memory_space<vmem>>, vector<1x8x256xf32>
    %109 = vector.shape_cast %108 : vector<1x8x256xf32> to vector<8x256xf32>
    %110 = vector.shape_cast %107 : vector<8x256xf32> to vector<1x8x256xf32>
    tpu.vector_store %arg11[%c0_75, %c0_76, %c0_77], %110 {strides = array<i32>} : memref<1x8x256xf32, #tpu.memory_space<vmem>>, vector<1x8x256xf32>,
    return
  }
  func.func @transform_0(%arg0: i32) -> (i32, i32, i32) {
    %c0_i32 = arith.constant 0 : i32
    %c0_i32_0 = arith.constant 0 : i32
    %c0_i32_1 = arith.constant 0 : i32
    return %arg0, %c0_i32, %c0_i32_0 : i32, i32, i32
  }
  func.func @transform_1(%arg0: i32) -> (i32, i32, i32) {
    %c0_i32 = arith.constant 0 : i32
    %c0_i32_0 = arith.constant 0 : i32
    %c0_i32_1 = arith.constant 0 : i32
    %c0_i32_2 = arith.constant 0 : i32
    return %c0_i32, %c0_i32_0, %c0_i32_1 : i32, i32, i32
  }
  func.func @transform_2(%arg0: i32) -> (i32, i32) {
    %c0_i32 = arith.constant 0 : i32
    %c0_i32_0 = arith.constant 0 : i32
    %c0_i32_1 = arith.constant 0 : i32
    return %c0_i32, %c0_i32_0 : i32, i32
  }
  func.func @transform_3(%arg0: i32) -> (i32, i32) {
    %c0_i32 = arith.constant 0 : i32
    %c0_i32_0 = arith.constant 0 : i32
    %c0_i32_1 = arith.constant 0 : i32
    return %c0_i32, %c0_i32_0 : i32, i32
  }
  func.func @transform_4(%arg0: i32) -> (i32, i32, i32) {
    %c0_i32 = arith.constant 0 : i32
    %c0_i32_0 = arith.constant 0 : i32
    %c0_i32_1 = arith.constant 0 : i32
    %c0_i32_2 = arith.constant 0 : i32
    return %c0_i32, %c0_i32_0, %c0_i32_1 : i32, i32, i32
  }
  func.func @transform_5(%arg0: i32) -> (i32, i32) {
    %c0_i32 = arith.constant 0 : i32
    %c0_i32_0 = arith.constant 0 : i32
    %c0_i32_1 = arith.constant 0 : i32
    return %c0_i32, %c0_i32_0 : i32, i32
  }
  func.func @transform_6(%arg0: i32) -> (i32, i32) {
    %c0_i32 = arith.constant 0 : i32
    %c0_i32_0 = arith.constant 0 : i32
    %c0_i32_1 = arith.constant 0 : i32
    return %c0_i32, %c0_i32_0 : i32, i32
  }
  func.func @transform_7(%arg0: i32) -> (i32, i32) {
    %c0_i32 = arith.constant 0 : i32
    %c0_i32_0 = arith.constant 0 : i32
    %c0_i32_1 = arith.constant 0 : i32
    return %c0_i32, %c0_i32_0 : i32, i32
  }
  func.func @transform_8(%arg0: i32) -> (i32, i32) {
    %c0_i32 = arith.constant 0 : i32
    %c0_i32_0 = arith.constant 0 : i32
    %c0_i32_1 = arith.constant 0 : i32
    return %c0_i32, %c0_i32_0 : i32, i32
  }
  func.func @transform_9(%arg0: i32) -> (i32, i32) {
    %c0_i32 = arith.constant 0 : i32
    %c0_i32_0 = arith.constant 0 : i32
    %c0_i32_1 = arith.constant 0 : i32
    return %c0_i32, %c0_i32_0 : i32, i32
  }
  func.func @transform_10(%arg0: i32) -> (i32, i32, i32) {
    %c0_i32 = arith.constant 0 : i32
    %c0_i32_0 = arith.constant 0 : i32
    %c0_i32_1 = arith.constant 0 : i32
    return %arg0, %c0_i32, %c0_i32_0 : i32, i32, i32
  }
}

</mosaic_0001>

<bundles_post_ra>
// kernel: residual_forward.1
= control target key start
LH: loop header
LB: loop body
LE: loop exit
PB: predicated region body
PF: predicated region fallthrough
CT: control target
= control target key end

     0   :  { %s1382_s13 = smov 0   ;;  %s1555_s0 = inlined_call_operand.vmem [shape: f32[2,4,256], index: 0, kind: input, shape index: {}]   ;;  %s1556_s1 = inlined_call_operand.vmem [shape: f32[9,1,256], index: 1, kind: input, shape index: {}]   ;;  %s1557_s2 = inlined_call_operand.vmem [shape: f32[4,4], index: 2, kind: input, shape index: {}]   ;;  %s1558_s3 = inlined_call_operand.vmem [shape: f32[4,1], index: 3, kind: input, shape index: {}]   ;;  %s1559_s4 = inlined_call_operand.vmem [shape: f32[9,4,4], index: 4, kind: input, shape index: {}]   ;;  %s1560_s5 = inlined_call_operand.vmem [shape: f32[4,1], index: 5, kind: input, shape index: {}]   ;;  %s1561_s6 = inlined_call_operand.vmem [shape: f32[8,4], index: 6, kind: input, shape index: {}]   ;;  %s1562_s7 = inlined_call_operand.vmem [shape: f32[8,1], index: 7, kind: input, shape index: {}]   ;;  %s1563_s8 = inlined_call_operand.vmem [shape: f32[8,4], index: 8, kind: input, shape index: {}]   ;;  %s1564_s9 = inlined_call_operand.vmem [shape: f32[8,1], index: 9, kind: input, shape index: {}]   ;;  %s1565_s10 = inlined_call_operand.vmem [shape: f32[2,8,256], index: 10, kind: output, shape index: {}]  }
   0x1 LB: > { %s1214_s14 = sadd.s32 4294967295, %s1316_s13   ;;  %p1218_p0 = scmp.ge.s32.totalorder %s1316_s13, 1  ;;  %s1316_s13 = sphi %s1382_s13, %s20_s13  }
   0x2   : > { %p312_p1 = scmp.lt.s32.totalorder %s1316_s13, 3 }
   0x4   : > { %p313_p2 = pnand %p1218_p0, %p312_p1 }
   0x5   : > { %p350_p3 = scmp.lt.s32.totalorder (!%p313_p2), %s1214_s14, 1  ;;  %s1319_s23 = smov (!%p313_p2), 15  }
   0x6   : > { %316 = sbr.rel (%p313_p2) target bundleno = 582 (0x246), region = 60  ;;  %s1320_s24 = smov (!%p313_p2), 16  }
   0x7   : > { %s1321_s25 = smov (!%p313_p2), 17   ;;  %s1322_s26 = smov (!%p313_p2), 1  }
   0x8   : > { %s1323_s27 = smov (!%p313_p2), 113   ;;  %s1324_s28 = smov (!%p313_p2), 127  }
   0x9   : > { %s1325_s29 = smov (!%p313_p2), 111   ;;  %s1326_s30 = smov (!%p313_p2), 112  }
   0xb   : > { %v1318_v0 = vmov 0   ;;  %v362_v1 = vld [vmem:[%s1558_s3] sm:$0xf]  ;;  %s1567_s14 = smov (!%p350_p3, %s1214_s14), 1  ;;  %vm376_vm0 = vcmask 1043456   ;;  %vm372_vm1 = vcmask 31744   ;;  %v431_v16 = vlaneseq }
   0xc   : > { %1307 = vset.pattern.permute.xlu0 %v1318_v0  ;;  %1308 = vset.pattern.permute.xlu2 %v1318_v0  ;;  %s1288_s17 = sshll.u32 %s1567_s14, 3  ;;  %v361_v3 = vld [vmem:[%s1557_s2] sm:$0xf]  ;;  %v1228_v29 = vld [vmem:[%s1559_s4 + $0x4] sm:$0xf]  ;;  %s1289_s21 = sshll.u32 %s1567_s14, 4 }
   0xd   : > { %365 = vperm.xlu0 %1307, %v362_v1   ;;  %1309 = vset.pattern.permute.xlu1 %v1318_v0  ;;  %s354_s20 = scalar_lea.vmem %s1555_s0, %s1288_s17  ;;  %v1043_v15 = vld [vmem:[%s1562_s7] sm:$0xff]  ;;  %v1429_v18 = vand.u32 127, %v431_v16  ;;  %v1238_v49 = vld [vmem:[%s1559_s4 + $0x8] sm:$0xf]  ;;  %v1244_v59 = vld [vmem:[%s1559_s4 + $0xc] sm:$0xf] }
   0xe   : > { %v360_v2 = vld [vmem:[%s354_s20] sm:$0xff]  ;;  %v1260_v60 = vld [vmem:[%s1556_s1 + $0xc] sm:$0x3]  ;;  %v1249_v61 = vld [vmem:[%s1559_s4 + $0x10] sm:$0xf] }
   0xf   : > { %369 = vst [vmem:[#allocation1] ss:$2 sm:$0xff] %v360_v2  ;;  %v1227_v19 = vld [vmem:[%s1556_s1 + $0x2] sm:$0x3]  ;;  %vm449_vm4 = vcmp.lt.s32.totalorder %v1429_v18, 16  ;;  %vm565_vm5 = vcmp.lt.s32.totalorder %v1429_v18, 15 }
  0x10   : > { %v455_v20 = vperm.slane %v1227_v19, 0  ;;  %v456_v21 = vperm.slane %v1227_v19, 1  ;;  %v1237_v30 = vld [vmem:[%s1556_s1 + $0x4] sm:$0x3]  ;;  %v436_v31 = vld [vmem:[%s1556_s1] sm:$0x3] }
  0x11   : > { %v571_v32 = vperm.slane %v1237_v30, 0  ;;  %v572_v33 = vperm.slane %v1237_v30, 1  ;;  %vm433_vm6 = vcmp.lt.s32.totalorder %v1429_v18, 17  ;;  %v438_v34 = vperm.slane %v436_v31, 0  ;;  %v444_v46 = vld [vmem:[%s1559_s4] sm:$0xf] }
  0x12   : > { %v439_v35 = vperm.slane %v436_v31, 1  ;;  %v1243_v47 = vld [vmem:[%s1556_s1 + $0x6] sm:$0x3]  ;;  %vm634_vm7 = vcmp.lt.s32.totalorder %v1429_v18, 1  ;;  %v1028_v52 = vld [vmem:[%s1560_s5] sm:$0xf] }
  0x13   : > { %v640_v50 = vperm.slane %v1243_v47, 0  ;;  %v641_v51 = vperm.slane %v1243_v47, 1  ;;  %v1254_v62 = vld [vmem:[%s1556_s1 + $0xa] sm:$0x3]  ;;  %vm825_vm8 = vcmp.lt.s32.totalorder %v1429_v18, 113  ;;  %v831_v0 = vperm.slane %v1260_v60, 0 }
  0x14   : > { %v832_v1 = vperm.slane %v1260_v60, 1  ;;  %vm756_vm9 = vcmp.lt.s32.totalorder %v1429_v18, 127  ;;  %v1261_v16 = vld [vmem:[%s1559_s4 + $0x18] sm:$0xf]  ;;  %vm963_vm10 = vcmp.lt.s32.totalorder %v1429_v18, 111  ;;  %vm894_vm11 = vcmp.lt.s32.totalorder %v1429_v18, 112 }
  0x16   : > { %v370_v4 = vld.sshfl [vmem:[#allocation1] sm:$0xff pattern:$0x75316420]  ;;  %v371_v5 = vld.sshfl [vmem:[#allocation1 + $0x8] sm:$0xff pattern:$0x75316420] }
  0x17   : > { %1223 = vmatpush.msk.msra.mxu0 %vm376_vm0, %v370_v4  ;;  %1225 = vmatpush.msk.msra.mxu1 %vm376_vm0, %v371_v5  ;;  %1105 = vst [vmem:[#allocation1] ss:$2 sm:$0xff] %v360_v2  ;;  %v762_v2 = vperm.slane %v1254_v62, 0 }
  0x18   : > { %1224 = vmatmul.msk.f32.vlgmr.msra.gmra.mxu0 %vm372_vm1, %v361_v3  ;;  %1226 = vmatmul.msk.f32.vlgmr.msra.gmra.mxu1 %vm372_vm1, %v361_v3  ;;  %v763_v3 = vperm.slane %v1254_v62, 1 }
  0x7f   : > { %v366_v6 = vpop.permute.xlu0 %365 }
  0x95   : > { %v398_v7 = vpop.f32.mrf.mxu0  ;;  %v418_v8 = vpop.f32.mrf.mxu1 }
  0x96   : > { %v399_v9 = vadd.f32 %v398_v7, %v366_v6  ;;  %v419_v10 = vadd.f32 %v418_v8, %v366_v6 }
  0x98   : > { %vm421_vm2 = vcmp.ge.f32.partialorder %v399_v9, 0.0  ;;  %v423_v11 = vmul.f32 0.2, %v399_v9  ;;  %vm422_vm3 = vcmp.ge.f32.partialorder %v419_v10, 0.0  ;;  %v424_v12 = vmul.f32 0.2, %v419_v10 }
  0x9a   : > { %v1406_v13 = vsel %vm421_vm2, %v399_v9, %v423_v11  ;;  %v1408_v14 = vsel %vm422_vm3, %v419_v10, %v424_v12 }
  0x9b   : > { %563 = vrot.lane.b32.xlu2 %v1408_v14, %s1319_s23  ;;  %447 = vrot.lane.b32.xlu1 %v1408_v14, %s1320_s24 }
  0x9c   : > { %445 = vrot.lane.b32.xlu0 %v1406_v13, %s1320_s24  ;;  %s359_s24 = scalar_lea.vmem %s1565_s10, %s1289_s21 }
  0xa3   : > { %427 = vrot.lane.b32.xlu2 %v1406_v13, %s1321_s25  ;;  %561 = vrot.lane.b32.xlu1 %v1406_v13, %s1319_s23 }
  0xa4   : > { %429 = vrot.lane.b32.xlu0 %v1408_v14, %s1321_s25 }
  0xab   : > { %632 = vrot.lane.b32.xlu2 %v1408_v14, %s1322_s26  ;;  %630 = vrot.lane.b32.xlu1 %v1406_v13, %s1322_s26 }
  0xac   : > { %821 = vrot.lane.b32.xlu0 %v1406_v13, %s1323_s27 }
  0xb3   : > { %752 = vrot.lane.b32.xlu2 %v1406_v13, %s1324_s28  ;;  %823 = vrot.lane.b32.xlu1 %v1408_v14, %s1323_s27 }
  0xb4   : > { %754 = vrot.lane.b32.xlu0 %v1408_v14, %s1324_s28 }
  0xbb   : > { %961 = vrot.lane.b32.xlu2 %v1408_v14, %s1325_s29  ;;  %959 = vrot.lane.b32.xlu1 %v1406_v13, %s1325_s29 }
  0xbc   : > { %890 = vrot.lane.b32.xlu0 %v1406_v13, %s1326_s30 }
  0xc3   : > { %892 = vrot.lane.b32.xlu1 %v1408_v14, %s1326_s30  ;;  %1031 = vperm.xlu2 %1308, %v1028_v52  }
  0xc4   : > { %1046 = vperm.xlu0 %1307, %v1043_v15   ;;  %v1272_v15 = vld [vmem:[%s1556_s1 + $0x10] sm:$0x3] }
  0xc5   : > { %v970_v19 = vperm.slane %v1272_v15, 1 }
  0xf5   : > { %v564_v17 = vpop.permute.xlu2 %563 }
  0xfd   : > { %v428_v24 = vpop.permute.xlu2 %427 }
 0x105   : > { %v633_v48 = vpop.permute.xlu2 %632 }
 0x10d   : > { %v448_v22 = vpop.permute.xlu1 %447  ;;  %v753_v63 = vpop.permute.xlu2 %752 }
 0x10e   : > { %v446_v23 = vpop.permute.xlu0 %445 }
 0x10f   : > { %v450_v25 = vsel %vm449_vm4, %v446_v23, %v448_v22  ;;  %v451_v26 = vsel %vm449_vm4, %v448_v22, %v446_v23 }
 0x110   : > { %v459_v27 = vmul.f32 %v455_v20, %v451_v26  ;;  %v460_v28 = vmul.f32 %v456_v21, %v450_v25  ;;  %v1266_v26 = vld [vmem:[%s1556_s1 + $0xe] sm:$0x3] }
 0x112   : > { %1229 = vmatpush.msk.msra.mxu2 %vm376_vm0, %v459_v27  ;;  %1231 = vmatpush.msk.msra.mxu3 %vm376_vm0, %v460_v28  ;;  %v1273_v27 = vld [vmem:[%s1559_s4 + $0x20] sm:$0xf]  ;;  %v900_v28 = vperm.slane %v1266_v26, 0 }
 0x113   : > { %1230 = vmatmul.msk.f32.vlgmr.msra.gmra.mxu2 %vm372_vm1, %v1228_v29  ;;  %1232 = vmatmul.msk.f32.vlgmr.msra.gmra.mxu3 %vm372_vm1, %v1228_v29  ;;  %v901_v29 = vperm.slane %v1266_v26, 1 }
 0x115   : > { %v562_v36 = vpop.permute.xlu1 %561  ;;  %v962_v20 = vpop.permute.xlu2 %961 }
 0x116   : > { %v566_v37 = vsel %vm565_vm5, %v562_v36, %v564_v17  ;;  %v567_v38 = vsel %vm565_vm5, %v564_v17, %v562_v36  ;;  %v430_v39 = vpop.permute.xlu0 %429  ;;  %v969_v17 = vperm.slane %v1272_v15, 0  ;;  %v1267_v36 = vld [vmem:[%s1559_s4 + $0x1c] sm:$0xf]  ;;  %v1042_v15 = vld [vmem:[%s1561_s6] sm:$0xff] }
 0x117   : > { %v575_v40 = vmul.f32 %v571_v32, %v567_v38  ;;  %v576_v41 = vmul.f32 %v572_v33, %v566_v37  ;;  %v434_v42 = vsel %vm433_vm6, %v428_v24, %v430_v39  ;;  %v435_v43 = vsel %vm433_vm6, %v430_v39, %v428_v24 }
 0x118   : > { %v442_v44 = vmul.f32 %v438_v34, %v435_v43  ;;  %v443_v45 = vmul.f32 %v439_v35, %v434_v42  ;;  %v1098_v42 = vld [vmem:[%s1563_s8] sm:$0xff] }
 0x119   : > { %1239 = vmatpush.msk.msrb.mxu2 %vm376_vm0, %v575_v40  ;;  %1241 = vmatpush.msk.msrb.mxu3 %vm376_vm0, %v576_v41  ;;  %v1106_v40 = vld.sshfl [vmem:[#allocation1] sm:$0xff pattern:$0x75316420]  ;;  %v1107_v41 = vld.sshfl [vmem:[#allocation1 + $0x8] sm:$0xff pattern:$0x75316420] }
 0x11a   : > { %1233 = vmatpush.msk.msrb.mxu0 %vm376_vm0, %v442_v44  ;;  %1235 = vmatpush.msk.msrb.mxu1 %vm376_vm0, %v443_v45  ;;  %v1099_v45 = vld [vmem:[%s1564_s9] sm:$0xff] }
 0x11b   : > { %1234 = vmatmul.msk.f32.vlgmr.msrb.gmra.mxu0 %vm372_vm1, %v444_v46  ;;  %1236 = vmatmul.msk.f32.vlgmr.msrb.gmra.mxu1 %vm372_vm1, %v444_v46 }
 0x11c   : > { %1240 = vmatmul.msk.f32.vlgmr.msrb.gmra.mxu2 %vm372_vm1, %v1238_v49  ;;  %1242 = vmatmul.msk.f32.vlgmr.msrb.gmra.mxu3 %vm372_vm1, %v1238_v49 }
 0x11d   : > { %1250 = vmatpush.msk.msra.mxu2 %vm376_vm0, %v1406_v13  ;;  %1252 = vmatpush.msk.msra.mxu3 %vm376_vm0, %v1408_v14  ;;  %v631_v53 = vpop.permute.xlu1 %630  ;;  %v1255_v14 = vld [vmem:[%s1559_s4 + $0x14] sm:$0xf] }
 0x11e   : > { %v635_v54 = vsel %vm634_vm7, %v631_v53, %v633_v48  ;;  %v636_v55 = vsel %vm634_vm7, %v633_v48, %v631_v53  ;;  %v822_v56 = vpop.permute.xlu0 %821  ;;  %1102 = vperm.xlu1 %1309, %v1099_v45  }
 0x11f   : > { %v644_v57 = vmul.f32 %v640_v50, %v636_v55  ;;  %v645_v58 = vmul.f32 %v641_v51, %v635_v54 }
 0x121   : > { %1245 = vmatpush.msk.msra.mxu0 %vm376_vm0, %v644_v57  ;;  %1247 = vmatpush.msk.msra.mxu1 %vm376_vm0, %v645_v58 }
 0x123   : > { %1246 = vmatmul.msk.f32.vlgmr.msra.gmra.mxu0 %vm372_vm1, %v1244_v59  ;;  %1248 = vmatmul.msk.f32.vlgmr.msra.gmra.mxu1 %vm372_vm1, %v1244_v59 }
 0x124   : > { %1251 = vmatmul.msk.f32.vlgmr.msra.gmra.mxu2 %vm372_vm1, %v1249_v61  ;;  %1253 = vmatmul.msk.f32.vlgmr.msra.gmra.mxu3 %vm372_vm1, %v1249_v61 }
 0x125   : > { %v824_v4 = vpop.permute.xlu1 %823 }
 0x126   : > { %v826_v5 = vsel %vm825_vm8, %v822_v56, %v824_v4  ;;  %v827_v6 = vsel %vm825_vm8, %v824_v4, %v822_v56  ;;  %v755_v7 = vpop.permute.xlu0 %754 }
 0x127   : > { %v835_v8 = vmul.f32 %v831_v0, %v826_v5  ;;  %v836_v9 = vmul.f32 %v832_v1, %v827_v6  ;;  %v757_v10 = vsel %vm756_vm9, %v753_v63, %v755_v7  ;;  %v758_v11 = vsel %vm756_vm9, %v755_v7, %v753_v63 }
 0x128   : > { %v766_v12 = vmul.f32 %v762_v2, %v757_v10  ;;  %v767_v13 = vmul.f32 %v763_v3, %v758_v11 }
 0x129   : > { %1262 = vmatpush.msk.msrb.mxu2 %vm376_vm0, %v835_v8  ;;  %1264 = vmatpush.msk.msrb.mxu3 %vm376_vm0, %v836_v9  ;;  %v1032_v8 = vpop.permute.xlu2 %1031 }
 0x12a   : > { %1256 = vmatpush.msk.msrb.mxu0 %vm376_vm0, %v766_v12  ;;  %1258 = vmatpush.msk.msrb.mxu1 %vm376_vm0, %v767_v13 }
 0x12b   : > { %1257 = vmatmul.msk.f32.vlgmr.msrb.gmra.mxu0 %vm372_vm1, %v1255_v14  ;;  %1259 = vmatmul.msk.f32.vlgmr.msrb.gmra.mxu1 %vm372_vm1, %v1255_v14 }
 0x12c   : > { %1263 = vmatmul.msk.f32.vlgmr.msrb.gmra.mxu2 %vm372_vm1, %v1261_v16  ;;  %1265 = vmatmul.msk.f32.vlgmr.msrb.gmra.mxu3 %vm372_vm1, %v1261_v16 }
 0x12d   : > { %v960_v21 = vpop.permute.xlu1 %959 }
 0x12e   : > { %v964_v22 = vsel %vm963_vm10, %v960_v21, %v962_v20  ;;  %v965_v23 = vsel %vm963_vm10, %v962_v20, %v960_v21  ;;  %v891_v30 = vpop.permute.xlu0 %890 }
 0x12f   : > { %v973_v24 = vmul.f32 %v969_v17, %v964_v22  ;;  %v974_v25 = vmul.f32 %v970_v19, %v965_v23 }
 0x131   : > { %1274 = vmatpush.msk.msra.mxu2 %vm376_vm0, %v973_v24  ;;  %1276 = vmatpush.msk.msra.mxu3 %vm376_vm0, %v974_v25 }
 0x133   : > { %1282 = vmatpush.msk.msrb.mxu2 %vm376_vm0, %v1106_v40  ;;  %1284 = vmatpush.msk.msrb.mxu3 %vm376_vm0, %v1107_v41 }
 0x134   : > { %1275 = vmatmul.msk.f32.vlgmr.msra.gmra.mxu2 %vm372_vm1, %v1273_v27  ;;  %1277 = vmatmul.msk.f32.vlgmr.msra.gmra.mxu3 %vm372_vm1, %v1273_v27 }
 0x135   : > { %v893_v31 = vpop.permute.xlu1 %892 }
 0x136   : > { %v895_v32 = vsel %vm894_vm11, %v891_v30, %v893_v31  ;;  %v896_v33 = vsel %vm894_vm11, %v893_v31, %v891_v30  ;;  %v1047_v22 = vpop.permute.xlu0 %1046 }
 0x137   : > { %v904_v34 = vmul.f32 %v900_v28, %v895_v32  ;;  %v905_v35 = vmul.f32 %v901_v29, %v896_v33 }
 0x139   : > { %1268 = vmatpush.msk.msra.mxu0 %vm376_vm0, %v904_v34  ;;  %1270 = vmatpush.msk.msra.mxu1 %vm376_vm0, %v905_v35 }
 0x13a   : > { %1269 = vmatmul.msk.f32.vlgmr.msra.gmra.mxu0 %vm372_vm1, %v1267_v36  ;;  %1271 = vmatmul.msk.f32.vlgmr.msra.gmra.mxu1 %vm372_vm1, %v1267_v36 }
 0x13c   : > { %1283 = vmatmul.msk.f32.vlgmr.msrb.gmra.mxu2 %vm372_vm1, %v1098_v42  ;;  %1285 = vmatmul.msk.f32.vlgmr.msrb.gmra.mxu3 %vm372_vm1, %v1098_v42 }
 0x190   : > { %v1103_v19 = vpop.permute.xlu1 %1102 }
 0x196   : > { %v489_v18 = vpop.f32.mrf.mxu2  ;;  %v509_v37 = vpop.f32.mrf.mxu3 }
 0x198   : > { %v538_v38 = vpop.f32.mrf.mxu0  ;;  %v558_v39 = vpop.f32.mrf.mxu1 }
 0x199   : > { %v539_v50 = vadd.f32 %v538_v38, %v489_v18  ;;  %v559_v51 = vadd.f32 %v558_v39, %v509_v37 }
 0x19f   : > { %v605_v43 = vpop.f32.mrf.mxu2  ;;  %v625_v44 = vpop.f32.mrf.mxu3 }
 0x1a0   : > { %v674_v46 = vpop.f32.mrf.mxu0  ;;  %v694_v47 = vpop.f32.mrf.mxu1  ;;  %v628_v52 = vadd.f32 %v605_v43, %v539_v50  ;;  %v629_v53 = vadd.f32 %v625_v44, %v559_v51 }
 0x1a2   : > { %v697_v54 = vadd.f32 %v674_v46, %v628_v52  ;;  %v698_v55 = vadd.f32 %v694_v47, %v629_v53 }
 0x1a7   : > { %v727_v48 = vpop.f32.mrf.mxu2  ;;  %v747_v49 = vpop.f32.mrf.mxu3 }
 0x1a8   : > { %v796_v56 = vpop.f32.mrf.mxu0  ;;  %v816_v57 = vpop.f32.mrf.mxu1  ;;  %v750_v58 = vadd.f32 %v727_v48, %v697_v54  ;;  %v751_v59 = vadd.f32 %v747_v49, %v698_v55 }
 0x1aa   : > { %v819_v62 = vadd.f32 %v796_v56, %v750_v58  ;;  %v820_v63 = vadd.f32 %v816_v57, %v751_v59 }
 0x1af   : > { %v865_v60 = vpop.f32.mrf.mxu2  ;;  %v885_v61 = vpop.f32.mrf.mxu3 }
 0x1b0   : > { %v888_v0 = vadd.f32 %v865_v60, %v819_v62  ;;  %v889_v1 = vadd.f32 %v885_v61, %v820_v63 }
 0x1b7   : > { %v934_v2 = vpop.f32.mrf.mxu0  ;;  %v954_v3 = vpop.f32.mrf.mxu1 }
 0x1b8   : > { %v957_v4 = vadd.f32 %v934_v2, %v888_v0  ;;  %v958_v5 = vadd.f32 %v954_v3, %v889_v1  ;;  %v1003_v6 = vpop.f32.mrf.mxu2  ;;  %v1023_v7 = vpop.f32.mrf.mxu3 }
 0x1ba   : > { %v1026_v9 = vadd.f32 %v1003_v6, %v957_v4  ;;  %v1027_v10 = vadd.f32 %v1023_v7, %v958_v5 }
 0x1bc   : > { %v1034_v11 = vadd.f32 %v1032_v8, %v1026_v9  ;;  %v1035_v12 = vadd.f32 %v1032_v8, %v1027_v10 }
 0x1be   : > { %vm1036_vm12 = vcmp.ge.f32.partialorder %v1034_v11, 0.0  ;;  %vm1037_vm13 = vcmp.ge.f32.partialorder %v1035_v12, 0.0  ;;  %v1038_v13 = vmul.f32 0.2, %v1034_v11  ;;  %v1039_v14 = vmul.f32 0.2, %v1035_v12 }
 0x1c0   : > { %v1040_v16 = vsel %vm1036_vm12, %v1034_v11, %v1038_v13  ;;  %v1041_v17 = vsel %vm1037_vm13, %v1035_v12, %v1039_v14  ;;  %v1132_v20 = vpop.f32.mrf.mxu2  ;;  %v1152_v21 = vpop.f32.mrf.mxu3 }
 0x1c1   : > { %1278 = vmatpush.msk.msrb.mxu0 %vm376_vm0, %v1040_v16  ;;  %1280 = vmatpush.msk.msrb.mxu1 %vm376_vm0, %v1041_v17  ;;  %v1133_v23 = vadd.f32 %v1132_v20, %v1103_v19  ;;  %v1153_v24 = vadd.f32 %v1152_v21, %v1103_v19 }
 0x1c2   : > { %1279 = vmatmul.msk.f32.vlgmr.msrb.gmra.mxu0 %vm372_vm1, %v1042_v15  ;;  %1281 = vmatmul.msk.f32.vlgmr.msrb.gmra.mxu1 %vm372_vm1, %v1042_v15 }
 0x23f   : > { %v1075_v25 = vpop.f32.mrf.mxu0  ;;  %v1095_v26 = vpop.f32.mrf.mxu1 }
 0x240   : > { %v1076_v27 = vadd.f32 %v1075_v25, %v1047_v22  ;;  %v1096_v28 = vadd.f32 %v1095_v26, %v1047_v22 }
 0x242   : > { %v1155_v29 = vadd.f32 %v1133_v23, %v1076_v27  ;;  %v1156_v30 = vadd.f32 %v1153_v24, %v1096_v28 }
 0x244   : > { %1157 = vst [vmem:[%s359_s24] sm:$0xff] %v1155_v29 }
 0x245   : > { %1158 = vst [vmem:[%s359_s24 + $0x8] sm:$0xff] %v1156_v30 }
 0x246 PF: > { %s20_s13 = sadd.s32 1, %s1316_s13  }
 0x247   : > { %p17_p4 = scmp.ge.s32.totalorder %s20_s13, 4  }
 0x249   :  { %19 = sbr.rel (!%p17_p4) target bundleno = 1 (0x1), region = 105 }

</bundles_post_ra>
